<compile_context>
chip_gen: v7x
topology: tpu7x:2x2x1
jax: 0.10.0
libtpu: 0.0.40
codegen_flags: <defaults>
</compile_context>

<pallas_src>
import jax
import jax.numpy as jnp
from jax.experimental import pallas as pl
from jax.experimental.pallas import tpu as pltpu


# ----------------------------------------------------------------------------
# Fused kernel factory
# ----------------------------------------------------------------------------
def _make_fused_kernel(kinds, selected_flags):
    """Build a fused kernel for a fixed module structure.

    kinds          : tuple of "linear" / "relu", in execution order.
    selected_flags : tuple of bools, True if that module's output is selected.

    Kernel ref layout (inputs then outputs):
      x_ref, (w_ref, b_ref) per linear (in order), then one out_ref per
      selected module (in order).
    """
    n_linear = sum(1 for k in kinds if k == "linear")

    def kernel(*refs):
        x_ref = refs[0]
        param_refs = refs[1:1 + 2 * n_linear]
        out_refs = refs[1 + 2 * n_linear:]

        x = x_ref[...].astype(jnp.float32)
        li = 0
        oi = 0
        for kind, sel in zip(kinds, selected_flags):
            if kind == "linear":
                w = param_refs[2 * li][...]           # (Din, Dout), bf16
                b = param_refs[2 * li + 1][...]       # (1, Dout),   f32
                li += 1
                # bf16 MXU matmul, f32 accumulate, f32 bias add.
                x = jnp.dot(x.astype(w.dtype), w,
                            preferred_element_type=jnp.float32)
                x = x + b.astype(jnp.float32)
            elif kind == "relu":
                # Fused into the epilogue of the preceding matmul (VPU).
                x = jnp.maximum(x, 0.0)
            else:
                raise ValueError(f"unknown module kind {kind}")
            if sel:
                out_refs[oi][...] = x.astype(out_refs[oi].dtype)
                oi += 1

    return kernel


# ----------------------------------------------------------------------------
# SelectiveSequential forward: one fused pallas_call
# ----------------------------------------------------------------------------
def selective_sequential_forward(x, modules, to_select, *, batch_block=256):
    """modules: list of (name, kind, params) with kind in {"linear", "relu"}.

    Mirrors SelectiveSequential.forward: run modules in order, collect outputs
    of modules whose name is in `to_select`, return them as a Python list.
    All compute happens inside a single fused Pallas kernel.
    """
    kinds = tuple(k for (_, k, _) in modules)
    selected_flags = tuple(n in to_select for (n, _, _) in modules)

    B, feat = x.shape
    # Track feature width through the stack to build the selected out_shapes.
    out_shapes = []
    flat_params = []
    for (name, kind, params), sel in zip(modules, selected_flags):
        if kind == "linear":
            w, b = params
            flat_params += [w, b]
            feat = w.shape[1]
        if sel:
            out_shapes.append(jax.ShapeDtypeStruct((B, feat), x.dtype))
    out_shapes = tuple(out_shapes)
    n_out = len(out_shapes)

    kernel = _make_fused_kernel(kinds, selected_flags)

    if B <= batch_block:
        # Single block: whole arrays resident in VMEM, no grid / no pipeline
        # machinery, no double-buffering.
        vmem = pltpu.MemorySpace.VMEM
        in_specs = [pl.BlockSpec(memory_space=vmem)] * (1 + len(flat_params))
        out_specs = tuple(pl.BlockSpec(memory_space=vmem) for _ in range(n_out))
        outs = pl.pallas_call(
            kernel,
            out_shape=out_shapes,
            in_specs=in_specs,
            out_specs=out_specs,
            compiler_params=pltpu.CompilerParams(vmem_limit_bytes=32 << 20),
        )(x, *flat_params)
    else:
        # Batch-tiled grid: weights stay resident (same block every step),
        # activations stream.  "parallel" lets the batch axis shard across
        # v7x's two TensorCores (no-op on single-TC v5e/v6e).
        bm = batch_block
        assert B % bm == 0, "batch must be a multiple of batch_block"
        in_specs = [pl.BlockSpec((bm, x.shape[1]), lambda i: (i, 0))]
        for p in flat_params:
            in_specs.append(pl.BlockSpec(p.shape, lambda i: (0, 0)))
        out_specs = tuple(
            pl.BlockSpec((bm, s.shape[1]), lambda i: (i, 0)) for s in out_shapes)
        outs = pl.pallas_call(
            kernel,
            out_shape=out_shapes,
            grid=(B // bm,),
            in_specs=in_specs,
            out_specs=out_specs,
            compiler_params=pltpu.CompilerParams(
                dimension_semantics=("parallel",),
                vmem_limit_bytes=32 << 20),
        )(x, *flat_params)

    return list(outs)


# ----------------------------------------------------------------------------
# Deterministic parameter init (synthetic; no checkpoint loading)
# ----------------------------------------------------------------------------
def make_linear_params(key, d_in, d_out, compute_dtype=jnp.bfloat16):
    kw, kb = jax.random.split(key)
    bound = 1.0 / (d_in ** 0.5)
    # Same shapes as nn.Linear(d_in, d_out): weight (out, in), bias (out,)
    w_torch = jax.random.uniform(kw, (d_out, d_in), jnp.float32, -bound, bound)
    b = jax.random.uniform(kb, (d_out,), jnp.float32, -bound, bound)
    # Kernel layout: W (in, out) in bf16 for the MXU, bias (1, out) in f32,
    # both pre-shaped once here (no per-call reshape/transpose).
    return w_torch.T.astype(compute_dtype), b.reshape(1, d_out)


if __name__ == "__main__":
    key = jax.random.PRNGKey(0)
    k_x, k0, k2, k4 = jax.random.split(key, 4)

    # Lane-dense feature dims (multiples of 128) so every output is written
    # with full-lane stores and the MXU columns aren't wasted.
    d_in, d_hid, d_out = 128, 128, 128

    # modules_tuple = (Linear, ReLU, Linear, ReLU, Linear)
    modules = [
        ("0", "linear", make_linear_params(k0, d_in, d_hid)),
        ("1", "relu", None),
        ("2", "linear", make_linear_params(k2, d_hid, d_hid)),
        ("3", "relu", None),
        ("4", "linear", make_linear_params(k4, d_hid, d_out)),
    ]
    to_select = ("1", "3", "4")   # both post-ReLU activations + final output

    def jax_reference(xin):
        """Pure-JAX reference with the same bf16-weight / f32-accumulate math."""
        outs = []
        cur = xin
        for name, kind, params in modules:
            if kind == "linear":
                w, b = params
                cur = jnp.dot(cur.astype(w.dtype), w,
                              preferred_element_type=jnp.float32) + b
            else:
                cur = jnp.maximum(cur, 0.0)
            if name in to_select:
                outs.append(cur)
        return outs

    # --- small batch: single-block (no grid) fused kernel -------------------
    x_small = jax.random.normal(k_x, (8, d_in), jnp.float32)
    outs = selective_sequential_forward(x_small, modules, to_select)
    outs = [jax.block_until_ready(o) for o in outs]
    refs = jax_reference(x_small)
    assert len(outs) == len(refs) == len(to_select)
    for o, r in zip(outs, refs):
        assert o.shape == r.shape and o.dtype == r.dtype
        assert float(jnp.max(jnp.abs(o - r))) < 2e-3

    # --- larger batch: batch-tiled grid, "parallel" over batch --------------
    x_big = jax.random.normal(k_x, (512, d_in), jnp.float32)
    outs_big = selective_sequential_forward(x_big, modules, to_select,
                                            batch_block=128)
    outs_big = [jax.block_until_ready(o) for o in outs_big]
    refs_big = jax_reference(x_big)
    for o, r in zip(outs_big, refs_big):
        assert o.shape == r.shape and o.dtype == r.dtype
        assert float(jnp.max(jnp.abs(o - r))) < 2e-3

    print("KERNEL_OK")
</pallas_src>

<mosaic_0001>
module attributes {stable_mosaic.version = 11 : i64} {
  func.func @kernel(%arg0: memref<8x128xf32, #tpu.memory_space<vmem>>, %arg1: memref<128x128xbf16, #tpu.memory_space<vmem>>, %arg2: memref<1x128xf32, #tpu.memory_space<vmem>>, %arg3: memref<128x128xbf16, #tpu.memory_space<vmem>>, %arg4: memref<1x128xf32, #tpu.memory_space<vmem>>, %arg5: memref<128x128xbf16, #tpu.memory_space<vmem>>, %arg6: memref<1x128xf32, #tpu.memory_space<vmem>>, %arg7: memref<8x128xf32, #tpu.memory_space<vmem>>, %arg8: memref<8x128xf32, #tpu.memory_space<vmem>>, %arg9: memref<8x128xf32, #tpu.memory_space<vmem>>) attributes {dimension_semantics = [], scalar_prefetch = 0 : i64, scratch_operands = 0 : i64, tpu.core_type = #tpu.core_type<tc>} {
    %c0 = arith.constant 0 : index
    %c0_0 = arith.constant 0 : index
    %0 = vector.load %arg0[%c0, %c0_0] : memref<8x128xf32, #tpu.memory_space<vmem>>, vector<8x128xf32>
    %c0_1 = arith.constant 0 : index
    %c0_2 = arith.constant 0 : index
    %1 = vector.load %arg1[%c0_1, %c0_2] : memref<128x128xbf16, #tpu.memory_space<vmem>>, vector<128x128xbf16>
    %c0_3 = arith.constant 0 : index
    %c0_4 = arith.constant 0 : index
    %2 = vector.load %arg2[%c0_3, %c0_4] : memref<1x128xf32, #tpu.memory_space<vmem>>, vector<1x128xf32>
    %3 = arith.truncf %0 : vector<8x128xf32> to vector<8x128xbf16>
    %cst = arith.constant dense<0.000000e+00> : vector<8x128xf32>
    %4 = tpu.matmul %3, %1, %cst {dimension_numbers = #tpu.dot_dimension_numbers<[1], [0], [0], [1], [0, 0, 1, 1], [], []>} : vector<8x128xbf16>, vector<128x128xbf16>, vector<8x128xf32> -> vector<8x128xf32>
    %5 = vector.broadcast %2 : vector<1x128xf32> to vector<8x128xf32>
    %6 = arith.addf %4, %5 : vector<8x128xf32>
    %cst_5 = arith.constant 0.000000e+00 : f32
    %7 = vector.broadcast %cst_5 : f32 to vector<8x128xf32>
    %8 = arith.maximumf %6, %7 : vector<8x128xf32>
    %c0_6 = arith.constant 0 : index
    %c0_7 = arith.constant 0 : index
    %9 = vector.load %arg7[%c0_6, %c0_7] : memref<8x128xf32, #tpu.memory_space<vmem>>, vector<8x128xf32>
    tpu.vector_store %arg7[%c0_6, %c0_7], %8 {strides = array<i32>} : memref<8x128xf32, #tpu.memory_space<vmem>>, vector<8x128xf32>,
    %c0_8 = arith.constant 0 : index
    %c0_9 = arith.constant 0 : index
    %10 = vector.load %arg3[%c0_8, %c0_9] : memref<128x128xbf16, #tpu.memory_space<vmem>>, vector<128x128xbf16>
    %c0_10 = arith.constant 0 : index
    %c0_11 = arith.constant 0 : index
    %11 = vector.load %arg4[%c0_10, %c0_11] : memref<1x128xf32, #tpu.memory_space<vmem>>, vector<1x128xf32>
    %12 = arith.truncf %8 : vector<8x128xf32> to vector<8x128xbf16>
    %cst_12 = arith.constant dense<0.000000e+00> : vector<8x128xf32>
    %13 = tpu.matmul %12, %10, %cst_12 {dimension_numbers = #tpu.dot_dimension_numbers<[1], [0], [0], [1], [0, 0, 1, 1], [], []>} : vector<8x128xbf16>, vector<128x128xbf16>, vector<8x128xf32> -> vector<8x128xf32>
    %14 = vector.broadcast %11 : vector<1x128xf32> to vector<8x128xf32>
    %15 = arith.addf %13, %14 : vector<8x128xf32>
    %cst_13 = arith.constant 0.000000e+00 : f32
    %16 = vector.broadcast %cst_13 : f32 to vector<8x128xf32>
    %17 = arith.maximumf %15, %16 : vector<8x128xf32>
    %c0_14 = arith.constant 0 : index
    %c0_15 = arith.constant 0 : index
    %18 = vector.load %arg8[%c0_14, %c0_15] : memref<8x128xf32, #tpu.memory_space<vmem>>, vector<8x128xf32>
    tpu.vector_store %arg8[%c0_14, %c0_15], %17 {strides = array<i32>} : memref<8x128xf32, #tpu.memory_space<vmem>>, vector<8x128xf32>,
    %c0_16 = arith.constant 0 : index
    %c0_17 = arith.constant 0 : index
    %19 = vector.load %arg5[%c0_16, %c0_17] : memref<128x128xbf16, #tpu.memory_space<vmem>>, vector<128x128xbf16>
    %c0_18 = arith.constant 0 : index
    %c0_19 = arith.constant 0 : index
    %20 = vector.load %arg6[%c0_18, %c0_19] : memref<1x128xf32, #tpu.memory_space<vmem>>, vector<1x128xf32>
    %21 = arith.truncf %17 : vector<8x128xf32> to vector<8x128xbf16>
    %cst_20 = arith.constant dense<0.000000e+00> : vector<8x128xf32>
    %22 = tpu.matmul %21, %19, %cst_20 {dimension_numbers = #tpu.dot_dimension_numbers<[1], [0], [0], [1], [0, 0, 1, 1], [], []>} : vector<8x128xbf16>, vector<128x128xbf16>, vector<8x128xf32> -> vector<8x128xf32>
    %23 = vector.broadcast %20 : vector<1x128xf32> to vector<8x128xf32>
    %24 = arith.addf %22, %23 : vector<8x128xf32>
    %c0_21 = arith.constant 0 : index
    %c0_22 = arith.constant 0 : index
    %25 = vector.load %arg9[%c0_21, %c0_22] : memref<8x128xf32, #tpu.memory_space<vmem>>, vector<8x128xf32>
    tpu.vector_store %arg9[%c0_21, %c0_22], %24 {strides = array<i32>} : memref<8x128xf32, #tpu.memory_space<vmem>>, vector<8x128xf32>,
    return
  }
}

</mosaic_0001>

<bundles_post_ra>
// kernel: tpu_custom_call.1
= control target key start
LH: loop header
LB: loop body
LE: loop exit
PB: predicated region body
PF: predicated region fallthrough
CT: control target
= control target key end

     0   :  { %15 = vsyncpa [#allocation3], 0  ;;  %s977_s0 = inlined_call_operand.hbm [shape: f32[8,128], index: 0, kind: input, shape index: {}]   ;;  %s978_s1 = inlined_call_operand.hbm [shape: bf16[128,128], index: 1, kind: input, shape index: {}]   ;;  %s979_s2 = inlined_call_operand.vmem [shape: f32[1,128], index: 2, kind: input, shape index: {}]   ;;  %s980_s3 = inlined_call_operand.hbm [shape: bf16[128,128], index: 3, kind: input, shape index: {}]   ;;  %s981_s4 = inlined_call_operand.vmem [shape: f32[1,128], index: 4, kind: input, shape index: {}]   ;;  %s982_s5 = inlined_call_operand.hbm [shape: bf16[128,128], index: 5, kind: input, shape index: {}]   ;;  %s983_s6 = inlined_call_operand.vmem [shape: f32[1,128], index: 6, kind: input, shape index: {}]   ;;  %s984_s7 = inlined_call_operand.hbm [shape: f32[8,128], index: 7, kind: output, shape index: {0}]   ;;  %s985_s8 = inlined_call_operand.hbm [shape: f32[8,128], index: 8, kind: output, shape index: {1}]   ;;  %s986_s9 = inlined_call_operand.hbm [shape: f32[8,128], index: 9, kind: output, shape index: {2}]  }
   0x1   :  { %16 = vsyncpa [#allocation6], 0 }
   0x2   :  { %17 = vsyncpa [#allocation9], 0 }
   0x3   :  { %18 = vsyncpa [#allocation4], 0 }
   0x4   :  { %19 = vsyncpa [#allocation12], 0  ;;  %s784_s30 = smov [#allocation5]   ;;  %s620_s13 = scalar_lea.hbm %s978_s1, 1024 }
   0x5   :  { %s35_s10 = sshll.u32 %s784_s30, 4  ;;  %p621_p0 = scmp.ne.s32.totalorder %s978_s1, %s620_s13  ;;  %s36_s10 = int_to_ptr.vmem [resolvable:$true] %s35_s10 }
   0x6   :  { %p624_p1 = scmp.lt.u32.totalorder %s620_s13, %s978_s1 }
   0x8   :  { %p626_p2 = pnand %p624_p1, %p621_p0 }
   0xa   :  { %629 = shalt.err (!%p626_p2)
}
   0xb   :  { %s630_s18 = scalar_lea.vmem %s36_s10, 1024  ;;  %p635_p4 = scmp.lt.s32.totalorder %s36_s10, %s36_s10 }
   0xc   :  { %p631_p3 = scmp.ne.s32.totalorder %s36_s10, %s630_s18  ;;  %p636_p5 = scmp.lt.s32.totalorder %s630_s18, %s630_s18 }
   0xe   :  { %p637_p6 = por %p636_p5, %p635_p4 }
  0x10   :  { %p638_p7 = pnand %p637_p6, %p631_p3 }
  0x12   :  { %641 = shalt.err (!%p638_p7)
}
  0x13   :  { %s785_s19 = smov 64   ;;  %s786_s20 = smov 4  }
  0x14   :  { %41 = dma.hbm_to_vmem [thread:$0]  %s978_s1, 1024, %s36_s10, [#allocation6], %s785_s19, %s785_s19, %s786_s20  }
  0x15   :  { %s787_s23 = smov [#allocation2]   ;;  %s788_s25 = smov [#allocation7]  }
  0x16   :  { %s26_s24 = sshll.u32 %s787_s23, 4  ;;  %s49_s26 = sshll.u32 %s788_s25, 4  ;;  %s27_s24 = int_to_ptr.vmem [resolvable:$true] %s26_s24  ;;  %s50_s26 = int_to_ptr.vmem [resolvable:$true] %s49_s26 }
  0x17   :  { %s642_s29 = scalar_lea.hbm %s977_s0, 128 }
  0x18   :  { %p643_p8 = scmp.ne.s32.totalorder %s977_s0, %s642_s29  ;;  %p646_p9 = scmp.lt.u32.totalorder %s642_s29, %s977_s0 }
  0x1a   :  { %p648_p10 = pnand %p646_p9, %p643_p8 }
  0x1c   :  { %651 = shalt.err (!%p648_p10)
}
  0x1d   :  { %s652_s1 = scalar_lea.vmem %s27_s24, 128  ;;  %p657_p12 = scmp.lt.s32.totalorder %s27_s24, %s27_s24 }
  0x1e   :  { %p653_p11 = scmp.ne.s32.totalorder %s27_s24, %s652_s1  ;;  %p658_p13 = scmp.lt.s32.totalorder %s652_s1, %s652_s1 }
  0x20   :  { %p659_p0 = por %p658_p13, %p657_p12 }
  0x22   :  { %p660_p1 = pnand %p659_p0, %p653_p11 }
  0x24   :  { %663 = shalt.err (!%p660_p1)
}
  0x25   :  { %29 = dma.hbm_to_vmem [thread:$0]  %s977_s0, 128, %s27_s24, [#allocation3]  }
  0x26   :  { %s664_s17 = scalar_lea.hbm %s980_s3, 1024 }
  0x27   :  { %p665_p2 = scmp.ne.s32.totalorder %s980_s3, %s664_s17  ;;  %p668_p3 = scmp.lt.u32.totalorder %s664_s17, %s980_s3 }
  0x29   :  { %p670_p4 = pnand %p668_p3, %p665_p2 }
  0x2b   :  { %673 = shalt.err (!%p670_p4)
}
  0x2c   :  { %s674_s25 = scalar_lea.vmem %s50_s26, 1024  ;;  %p679_p6 = scmp.lt.s32.totalorder %s50_s26, %s50_s26 }
  0x2d   :  { %p675_p5 = scmp.ne.s32.totalorder %s50_s26, %s674_s25  ;;  %p680_p7 = scmp.lt.s32.totalorder %s674_s25, %s674_s25 }
  0x2f   :  { %p681_p8 = por %p680_p7, %p679_p6 }
  0x31   :  { %p682_p9 = pnand %p681_p8, %p675_p5 }
  0x33   :  { %685 = shalt.err (!%p682_p9)
}
  0x34   :  { %55 = dma.hbm_to_vmem [thread:$0]  %s980_s3, 1024, %s50_s26, [#allocation6], %s785_s19, %s785_s19, %s786_s20  }
  0x35   :  { %s789_s27 = smov [#allocation8]   ;;  %s686_s11 = scalar_lea.hbm %s982_s5, 1024 }
  0x36   :  { %s63_s28 = sshll.u32 %s789_s27, 4  ;;  %p687_p10 = scmp.ne.s32.totalorder %s982_s5, %s686_s11  ;;  %s64_s28 = int_to_ptr.vmem [resolvable:$true] %s63_s28 }
  0x37   :  { %p690_p11 = scmp.lt.u32.totalorder %s686_s11, %s982_s5 }
  0x39   :  { %p692_p12 = pnand %p690_p11, %p687_p10 }
  0x3b   :  { %695 = shalt.err (!%p692_p12)
}
  0x3c   :  { %s696_s14 = scalar_lea.vmem %s64_s28, 1024  ;;  %p701_p0 = scmp.lt.s32.totalorder %s64_s28, %s64_s28 }
  0x3d   :  { %p697_p13 = scmp.ne.s32.totalorder %s64_s28, %s696_s14  ;;  %p702_p1 = scmp.lt.s32.totalorder %s696_s14, %s696_s14 }
  0x3f   :  { %p703_p2 = por %p702_p1, %p701_p0 }
  0x41   :  { %p704_p3 = pnand %p703_p2, %p697_p13 }
  0x43   :  { %707 = shalt.err (!%p704_p3)
}
  0x44   :  { %69 = dma.hbm_to_vmem [thread:$0]  %s982_s5, 1024, %s64_s28, [#allocation9], %s785_s19, %s785_s19, %s786_s20  }
  0x45   :  { %774 = dma.done.wait [#allocation3], 128  }
  0x46   :  { %775 = vsyncadd [#allocation3], 4294967168 }
  0x47   :  { %776 = dma.done.wait [#allocation6], 2048  }
  0x48   :  { %777 = vsyncadd [#allocation6], 4294965248 }
  0x49   :  { %778 = dma.done.wait [#allocation9], 1024  }
  0x4a   :  { %779 = vsyncadd [#allocation9], 4294966272  ;;  %v790_v0 = vmov 0.0   ;;  %vm791_vm0 = vmmov 0   ;;  %v596_v1 = vld [vmem:[#allocation5] sm:$0xff]   ;;  %v597_v2 = vld [vmem:[#allocation5 + $0x8] sm:$0xff]  }
  0x4b   :  { %525 = vmatprep.subr.bf16.mxu0 %v790_v0  ;;  %541 = vmatprep.mubr.msk.bf16.mxu0 %vm791_vm0, %v790_v0  ;;  %v598_v3 = vld [vmem:[#allocation5 + $0x10] sm:$0xff]   ;;  %v604_v4 = vld [vmem:[#allocation7] sm:$0xff]   ;;  %v599_v5 = vld [vmem:[#allocation5 + $0x18] sm:$0xff]   ;;  %s793_s17 = smov [#allocation10]  }
  0x4c   :  { %545 = vmatprep.subr.bf16.mxu1 %v790_v0  ;;  %561 = vmatprep.mubr.msk.bf16.mxu1 %vm791_vm0, %v790_v0  ;;  %v605_v6 = vld [vmem:[#allocation7 + $0x8] sm:$0xff]   ;;  %v600_v7 = vld [vmem:[#allocation5 + $0x20] sm:$0xff]   ;;  %v606_v8 = vld [vmem:[#allocation7 + $0x10] sm:$0xff]   ;;  %s433_s18 = sshll.u32 %s793_s17, 4  ;;  %s434_s18 = int_to_ptr.vmem [resolvable:$true] %s433_s18 }
  0x4d   :  { %526 = vmatpush3.bf16.msra.mxu0 %v596_v1  ;;  %546 = vmatpush3.bf16.msra.mxu1 %v604_v4  ;;  %v601_v9 = vld [vmem:[#allocation5 + $0x28] sm:$0xff]   ;;  %v607_v10 = vld [vmem:[#allocation7 + $0x18] sm:$0xff]   ;;  %v602_v11 = vld [vmem:[#allocation5 + $0x30] sm:$0xff]  }
  0x4e   :  { %527 = vmatprep.subr.bf16.mxu0 %v790_v0  ;;  %547 = vmatprep.subr.bf16.mxu1 %v790_v0  ;;  %v608_v12 = vld [vmem:[#allocation7 + $0x20] sm:$0xff]   ;;  %v603_v13 = vld [vmem:[#allocation5 + $0x38] sm:$0xff]   ;;  %v609_v15 = vld [vmem:[#allocation7 + $0x28] sm:$0xff]  }
  0x4f   :  { %v85_v14 = vld [vmem:[#allocation2] sm:$0xff]  ;;  %v610_v17 = vld [vmem:[#allocation7 + $0x30] sm:$0xff]   ;;  %v612_v19 = vld [vmem:[#allocation8] sm:$0xff]  }
  0x50   :  { %v103_v16 = vpack.c.bf16 %v85_v14, %v85_v14  ;;  %v611_v18 = vld [vmem:[#allocation7 + $0x38] sm:$0xff]   ;;  %v613_v20 = vld [vmem:[#allocation8 + $0x8] sm:$0xff]   ;;  %v614_v21 = vld [vmem:[#allocation8 + $0x10] sm:$0xff]  }
  0x51   :  { %528 = vmatpush3.bf16.msra.mxu0 %v597_v2  ;;  %548 = vmatpush3.bf16.msra.mxu1 %v605_v6  ;;  %v615_v22 = vld [vmem:[#allocation8 + $0x18] sm:$0xff]   ;;  %v616_v23 = vld [vmem:[#allocation8 + $0x20] sm:$0xff]   ;;  %v617_v24 = vld [vmem:[#allocation8 + $0x28] sm:$0xff]  }
  0x52   :  { %529 = vmatprep.subr.bf16.mxu0 %v790_v0  ;;  %549 = vmatprep.subr.bf16.mxu1 %v790_v0  ;;  %v471_v25 = vld [vmem:[%s979_s2] ss:$0 sm:$0xff]  ;;  %v618_v33 = vld [vmem:[#allocation8 + $0x30] sm:$0xff]   ;;  %s792_s2 = smov [#allocation11]  }
  0x53   :  { %v619_v34 = vld [vmem:[#allocation8 + $0x38] sm:$0xff]   ;;  %s443_s16 = sshll.u32 %s792_s2, 4  ;;  %s444_s16 = int_to_ptr.vmem [resolvable:$true] %s443_s16 }
  0x54   :  { %v480_v35 = vld [vmem:[%s981_s4] ss:$0 sm:$0xff]  ;;  %s708_s21 = scalar_lea.vmem %s444_s16, 128  ;;  %p713_p5 = scmp.lt.s32.totalorder %s444_s16, %s444_s16 }
  0x55   :  { %530 = vmatpush3.bf16.msra.mxu0 %v598_v3  ;;  %550 = vmatpush3.bf16.msra.mxu1 %v606_v8  ;;  %p709_p4 = scmp.ne.s32.totalorder %s444_s16, %s708_s21  ;;  %p714_p6 = scmp.lt.s32.totalorder %s708_s21, %s708_s21 }
  0x56   :  { %531 = vmatprep.subr.bf16.mxu0 %v790_v0  ;;  %551 = vmatprep.subr.bf16.mxu1 %v790_v0 }
  0x57   :  { %p715_p7 = por %p714_p6, %p713_p5 }
  0x59   :  { %532 = vmatpush3.bf16.msra.mxu0 %v599_v5  ;;  %552 = vmatpush3.bf16.msra.mxu1 %v607_v10  ;;  %p716_p8 = pnand %p715_p7, %p709_p4 }
  0x5a   :  { %533 = vmatprep.subr.bf16.mxu0 %v790_v0  ;;  %553 = vmatprep.subr.bf16.mxu1 %v790_v0 }
  0x5d   :  { %534 = vmatpush3.bf16.msra.mxu0 %v600_v7  ;;  %554 = vmatpush3.bf16.msra.mxu1 %v608_v12 }
  0x5e   :  { %535 = vmatprep.subr.bf16.mxu0 %v790_v0  ;;  %555 = vmatprep.subr.bf16.mxu1 %v790_v0 }
  0x61   :  { %536 = vmatpush3.bf16.msra.mxu0 %v601_v9  ;;  %556 = vmatpush3.bf16.msra.mxu1 %v609_v15 }
  0x62   :  { %537 = vmatprep.subr.bf16.mxu0 %v790_v0  ;;  %557 = vmatprep.subr.bf16.mxu1 %v790_v0 }
  0x65   :  { %538 = vmatpush3.bf16.msra.mxu0 %v602_v11  ;;  %558 = vmatpush3.bf16.msra.mxu1 %v610_v17 }
  0x66   :  { %539 = vmatprep.subr.bf16.mxu0 %v790_v0  ;;  %559 = vmatprep.subr.bf16.mxu1 %v790_v0 }
  0x69   :  { %540 = vmatpush3.bf16.msra.mxu0 %v603_v13  ;;  %560 = vmatpush3.bf16.msra.mxu1 %v611_v18 }
  0x6a   :  { %565 = vmatprep.subr.bf16.mxu0 %v790_v0 }
  0x6c   :  { %542 = vmatmul.mubr.bf16.vlgmr.msra.gmra.mrb[0].mxu0 %v103_v16 }
  0x6d   :  { %581 = vmatprep.mubr.msk.bf16.mxu0 %vm791_vm0, %v790_v0  ;;  %566 = vmatpush3.bf16.msra.mxu0 %v612_v19 }
  0x6e   :  { %567 = vmatprep.subr.bf16.mxu0 %v790_v0 }
  0x71   :  { %568 = vmatpush3.bf16.msra.mxu0 %v613_v20 }
  0x72   :  { %569 = vmatprep.subr.bf16.mxu0 %v790_v0 }
  0x75   :  { %570 = vmatpush3.bf16.msra.mxu0 %v614_v21 }
  0x76   :  { %571 = vmatprep.subr.bf16.mxu0 %v790_v0 }
  0x79   :  { %572 = vmatpush3.bf16.msra.mxu0 %v615_v22 }
  0x7a   :  { %573 = vmatprep.subr.bf16.mxu0 %v790_v0 }
  0x7d   :  { %574 = vmatpush3.bf16.msra.mxu0 %v616_v23 }
  0x7e   :  { %575 = vmatprep.subr.bf16.mxu0 %v790_v0 }
  0x81   :  { %576 = vmatpush3.bf16.msra.mxu0 %v617_v24 }
  0x82   :  { %577 = vmatprep.subr.bf16.mxu0 %v790_v0 }
  0x85   :  { %578 = vmatpush3.bf16.msra.mxu0 %v618_v33 }
  0x86   :  { %579 = vmatprep.subr.bf16.mxu0 %v790_v0 }
  0x89   :  { %580 = vmatpush3.bf16.msra.mxu0 %v619_v34 }
 0x13f   :  { %v192_v26 = vpop.f32.mrb[0].mxu0 }
 0x140   :  { %v193_v27 = vadd.f32 %v471_v25, %v192_v26  ;;  %v543_v28 = vpop.f32.mrb[1].mxu0 }
 0x141   :  { %v195_v29 = vpop.f32.mrb[2].mxu0 }
 0x142   :  { %v198_v30 = vmax.f32 %v193_v27, 0.0  ;;  %v544_v31 = vpop.f32.mrb[3].mxu0 }
 0x144   :  { %v217_v32 = vpack.c.bf16 %v198_v30, %v198_v30  ;;  %199 = vst [vmem:[#allocation10] sm:$0xff] %v198_v30 }
 0x146   :  { %562 = vmatmul.mubr.bf16.vlgmr.msra.gmra.mrb[0].mxu1 %v217_v32 }
 0x219   :  { %v306_v36 = vpop.f32.mrb[0].mxu1 }
 0x21a   :  { %v307_v37 = vadd.f32 %v480_v35, %v306_v36  ;;  %v563_v38 = vpop.f32.mrb[1].mxu1 }
 0x21b   :  { %v309_v39 = vpop.f32.mrb[2].mxu1 }
 0x21c   :  { %v312_v40 = vmax.f32 %v307_v37, 0.0  ;;  %v564_v41 = vpop.f32.mrb[3].mxu1 }
 0x21e   :  { %v331_v42 = vpack.c.bf16 %v312_v40, %v312_v40  ;;  %313 = vst [vmem:[#allocation11] sm:$0xff] %v312_v40 }
 0x220   :  { %582 = vmatmul.mubr.bf16.vlgmr.msra.gmra.mrb[4].mxu0 %v331_v42 }
 0x221   :  { %719 = shalt.err (!%p716_p8)
}
 0x222   :  { %s720_s23 = scalar_lea.hbm %s985_s8, 128 }
 0x223   :  { %p721_p9 = scmp.ne.s32.totalorder %s985_s8, %s720_s23  ;;  %p724_p10 = scmp.lt.u32.totalorder %s720_s23, %s985_s8 }
 0x225   :  { %p726_p11 = pnand %p724_p10, %p721_p9 }
 0x227   :  { %729 = shalt.err (!%p726_p11)
}
 0x228   :  { %446 = dma.vmem_to_hbm [thread:$0]  %s444_s16, 128, %s985_s8, [#allocation12]  }
 0x229   :  { %s730_s30 = scalar_lea.vmem %s434_s18, 128  ;;  %p735_p13 = scmp.lt.s32.totalorder %s434_s18, %s434_s18 }
 0x22a   :  { %p731_p12 = scmp.ne.s32.totalorder %s434_s18, %s730_s30  ;;  %p736_p0 = scmp.lt.s32.totalorder %s730_s30, %s730_s30 }
 0x22c   :  { %p737_p1 = por %p736_p0, %p735_p13 }
 0x22e   :  { %p738_p2 = pnand %p737_p1, %p731_p12 }
 0x230   :  { %741 = shalt.err (!%p738_p2)
}
 0x231   :  { %s742_s13 = scalar_lea.hbm %s984_s7, 128 }
 0x232   :  { %p743_p3 = scmp.ne.s32.totalorder %s984_s7, %s742_s13  ;;  %p746_p4 = scmp.lt.u32.totalorder %s742_s13, %s984_s7 }
 0x234   :  { %p748_p5 = pnand %p746_p4, %p743_p3 }
 0x236   :  { %751 = shalt.err (!%p748_p5)
}
 0x237   :  { %436 = dma.vmem_to_hbm [thread:$0]  %s434_s18, 128, %s984_s7, [#allocation4]   ;;  %v489_v43 = vld [vmem:[%s983_s6] ss:$0 sm:$0xff] }
 0x238   :  { %s794_s20 = smov [#allocation13]  }
 0x239   :  { %s453_s15 = sshll.u32 %s794_s20, 4  ;;  %s454_s15 = int_to_ptr.vmem [resolvable:$true] %s453_s15 }
 0x23a   :  { %s752_s2 = scalar_lea.vmem %s454_s15, 128  ;;  %p757_p7 = scmp.lt.s32.totalorder %s454_s15, %s454_s15 }
 0x23b   :  { %p753_p6 = scmp.ne.s32.totalorder %s454_s15, %s752_s2  ;;  %p758_p8 = scmp.lt.s32.totalorder %s752_s2, %s752_s2 }
 0x23d   :  { %p759_p9 = por %p758_p8, %p757_p7 }
 0x23f   :  { %p760_p10 = pnand %p759_p9, %p753_p6 }
 0x2f3   :  { %v420_v44 = vpop.f32.mrb[4].mxu0 }
 0x2f4   :  { %v421_v45 = vadd.f32 %v489_v43, %v420_v44  ;;  %v583_v46 = vpop.f32.mrb[5].mxu0 }
 0x2f5   :  { %v423_v47 = vpop.f32.mrb[6].mxu0 }
 0x2f6   :  { %426 = vst [vmem:[#allocation13] sm:$0xff] %v421_v45  ;;  %v584_v48 = vpop.f32.mrb[7].mxu0 }
 0x2f7   :  { %763 = shalt.err (!%p760_p10)
}
 0x2f8   :  { %s764_s6 = scalar_lea.hbm %s986_s9, 128 }
 0x2f9   :  { %p765_p11 = scmp.ne.s32.totalorder %s986_s9, %s764_s6  ;;  %p768_p12 = scmp.lt.u32.totalorder %s764_s6, %s986_s9 }
 0x2fb   :  { %p770_p13 = pnand %p768_p12, %p765_p11 }
 0x2fd   :  { %773 = shalt.err (!%p770_p13)
}
 0x2fe   :  { %456 = dma.vmem_to_hbm [thread:$0]  %s454_s15, 128, %s986_s9, [#allocation12]  }
 0x2ff   :  { %780 = dma.done.wait [#allocation4], 128  }
 0x300   :  { %781 = vsyncadd [#allocation4], 4294967168 }
 0x301   :  { %782 = dma.done.wait [#allocation12], 256  }
 0x302   :  { %783 = vsyncadd [#allocation12], 4294967040 }
 0x303   :  { %466 = vsyncpa [#allocation3], 1 }
 0x304   :  { %467 = vsyncpa [#allocation6], 1 }
 0x305   :  { %468 = vsyncpa [#allocation9], 1 }
 0x306   :  { %469 = vsyncpa [#allocation4], 1 }
 0x307   :  { %470 = vsyncpa [#allocation12], 1 }

</bundles_post_ra>
